<compile_context>
chip_gen: v7x
topology: tpu7x:2x2x1
jax: 0.10.0
libtpu: 0.0.40
codegen_flags: <defaults>
</compile_context>

<pallas_src>
import jax
import jax.numpy as jnp
from jax.experimental import pallas as pl
from jax.experimental.pallas import tpu as pltpu


TARGET_BLOCK_BYTES = 4 * 1024 * 1024   # ~4 MiB blocks; 4 buffers -> <= 16 MiB VMEM
MIN_GRID_STEPS = 4                     # let v7x shard row tiles across both TCs
VMEM_LIMIT_BYTES = 32 * 1024 * 1024    # headroom on v5e/v6e (128 MiB) and v7x (64 MiB)


def _cdiv(a, b):
    return -(-a // b)


def _round_up(a, m):
    return _cdiv(a, m) * m


def _round_down(a, m):
    return (a // m) * m


def _mish_kernel(x_ref, o_ref):
    xf = x_ref[...].astype(jnp.float32)
    # tanh(softplus(x)) via tanh(log1p(t)) = t(t+2) / (t(t+2) + 2), t = e^x.
    # No clamp on the exponent: for x >~ 44 the numerator overflows to inf and
    # the ratio becomes NaN, but those lanes are discarded by the select below
    # (x > 20 fast path: torch softplus threshold=20 and tanh(x) == 1.0 in f32,
    # so mish(x) == x exactly there).  NaN inputs still propagate.
    t = jnp.exp(xf)
    num = t * (t + 2.0)
    den = num + 2.0
    # EUP approx reciprocal + one Newton-Raphson step (~1e-7 rel err) instead
    # of an exact divide; trims VPU/EUP pressure where compute approaches the
    # roofline (v7x f32, v6e bf16) and is free elsewhere (hidden under DMA).
    r = pl.reciprocal(den, approx=True)
    r = r * (2.0 - den * r)
    mish = xf * (num * r)
    o_ref[...] = jnp.where(xf > 20.0, xf, mish).astype(o_ref.dtype)


def _bitcast_view(x):
    """Return a 2-D or 3-D view of x that is a pure bitcast on TPU tiled layouts."""
    if x.ndim == 0:
        return x.reshape(1, 1)
    if x.ndim == 1:
        return x.reshape(1, x.shape[0])
    if x.ndim == 2:
        return x
    lead = 1
    for d in x.shape[:-2]:
        lead *= d
    r, c = x.shape[-2], x.shape[-1]
    if lead == 1:
        return x.reshape(r, c)
    if r % 8 == 0:
        # Merging the leading dims into the sublane dim keeps the (8,128)
        # tiling byte-identical -> no HBM relayout copy.
        return x.reshape(lead * r, c)
    return x.reshape(lead, r, c)


def mish_pallas(x):
    """Apply Mish elementwise to an arbitrary-shape array via a Pallas kernel."""
    orig_shape, dtype = x.shape, x.dtype
    view = _bitcast_view(x)
    itemsize = dtype.itemsize

    if view.ndim == 2:
        rows, cols = view.shape
        if rows <= 8:
            tile_rows = rows                       # block == full array dims
        else:
            cap = max(8, _round_down(TARGET_BLOCK_BYTES // (cols * itemsize), 8))
            split = max(8, _round_up(_cdiv(rows, MIN_GRID_STEPS), 8))
            tile_rows = min(cap, split)            # multiple of 8 -> ragged tail OK
        grid = (_cdiv(rows, tile_rows),)
        block = (tile_rows, cols)
        index_map = lambda i: (i, 0)
        semantics = ("parallel",)
    else:
        b, rows, cols = view.shape
        slab_bytes = rows * cols * itemsize
        if slab_bytes <= TARGET_BLOCK_BYTES:
            tile_rows = rows                       # full trailing dims per block
            tile_b = min(b,
                         max(1, TARGET_BLOCK_BYTES // slab_bytes),
                         max(1, _cdiv(b, MIN_GRID_STEPS)))
        else:
            tile_b = 1
            if rows <= 8:
                tile_rows = rows
            else:
                # TODO(synk): a single row wider than ~TARGET_BLOCK_BYTES is not
                # tiled further along the lane dim (not hit by YOLO activations).
                tile_rows = max(8, _round_down(TARGET_BLOCK_BYTES // (cols * itemsize), 8))
                tile_rows = min(tile_rows, _round_up(rows, 8))
        grid = (_cdiv(b, tile_b), _cdiv(rows, tile_rows))
        block = (tile_b, tile_rows, cols)
        index_map = lambda i, j: (i, j, 0)
        semantics = ("parallel", "parallel")

    out = pl.pallas_call(
        _mish_kernel,
        out_shape=jax.ShapeDtypeStruct(view.shape, dtype),
        grid_spec=pltpu.PrefetchScalarGridSpec(
            num_scalar_prefetch=0,
            grid=grid,
            in_specs=[pl.BlockSpec(block, index_map)],
            out_specs=pl.BlockSpec(block, index_map),
        ),
        compiler_params=pltpu.CompilerParams(
            dimension_semantics=semantics,
            vmem_limit_bytes=VMEM_LIMIT_BYTES,
        ),
    )(view)
    return out.reshape(orig_shape)


def mish_reference(x):
    xf = x.astype(jnp.float32)
    # Matches torch.nn.functional.softplus (threshold=20).
    sp = jnp.where(xf > 20.0, xf, jnp.log1p(jnp.exp(jnp.minimum(xf, 20.0))))
    return (xf * jnp.tanh(sp)).astype(x.dtype)


if __name__ == "__main__":
    key = jax.random.PRNGKey(0)
    # NCHW input, consistent with typical YOLO conv activations.
    x = jax.random.normal(key, (2, 4, 16, 16), dtype=jnp.float32) * 3.0

    y = mish_pallas(x)
    jax.block_until_ready(y)
    y_ref = mish_reference(x)
    assert y.shape == x.shape and y.dtype == x.dtype
    assert jnp.allclose(y, y_ref, atol=1e-5, rtol=1e-5)

    # Extremes: x > 20 fast path, overflow lanes (exp clamp removed), large negatives.
    x2 = jnp.array([-100.0, -30.0, -5.0, -1.0, 0.0, 0.5,
                    1.0, 5.0, 19.5, 20.5, 60.0, 100.0],
                   dtype=jnp.float32).reshape(2, 6)
    y2 = mish_pallas(x2)
    jax.block_until_ready(y2)
    assert jnp.allclose(y2, mish_reference(x2), atol=1e-5, rtol=1e-5)

    print("KERNEL_OK")
</pallas_src>

<mosaic_0001>
module attributes {stable_mosaic.version = 11 : i64} {
  func.func @_mish_kernel(%arg0: i32, %arg1: memref<32x16xf32, #tpu.memory_space<vmem>>, %arg2: memref<32x16xf32, #tpu.memory_space<vmem>>) attributes {dimension_semantics = [#tpu.dimension_semantics<parallel>], iteration_bounds = array<i64: 4>, scalar_prefetch = 0 : i64, scratch_operands = 0 : i64, tpu.core_type = #tpu.core_type<tc>, window_params = [{transform_indices = @transform_0, window_bounds = array<i64: 32, 16>}, {transform_indices = @transform_1, window_bounds = array<i64: 32, 16>}]} {
    %c0 = arith.constant 0 : index
    %c0_0 = arith.constant 0 : index
    %0 = vector.load %arg1[%c0, %c0_0] : memref<32x16xf32, #tpu.memory_space<vmem>>, vector<32x16xf32>
    %1 = math.exp %0 : vector<32x16xf32>
    %cst = arith.constant 2.000000e+00 : f32
    %2 = vector.broadcast %cst : f32 to vector<32x16xf32>
    %3 = arith.addf %1, %2 : vector<32x16xf32>
    %4 = arith.mulf %1, %3 : vector<32x16xf32>
    %cst_1 = arith.constant 2.000000e+00 : f32
    %5 = vector.broadcast %cst_1 : f32 to vector<32x16xf32>
    %6 = arith.addf %4, %5 : vector<32x16xf32>
    %7 = tpu.reciprocal %6 {approx = true} : vector<32x16xf32> -> vector<32x16xf32>
    %8 = arith.mulf %6, %7 : vector<32x16xf32>
    %cst_2 = arith.constant 2.000000e+00 : f32
    %9 = vector.broadcast %cst_2 : f32 to vector<32x16xf32>
    %10 = arith.subf %9, %8 : vector<32x16xf32>
    %11 = arith.mulf %7, %10 : vector<32x16xf32>
    %12 = arith.mulf %4, %11 : vector<32x16xf32>
    %13 = arith.mulf %0, %12 : vector<32x16xf32>
    %cst_3 = arith.constant 2.000000e+01 : f32
    %14 = vector.broadcast %cst_3 : f32 to vector<32x16xf32>
    %15 = arith.cmpf ogt, %0, %14 : vector<32x16xf32>
    %16 = arith.select %15, %0, %13 : vector<32x16xi1>, vector<32x16xf32>
    %c0_4 = arith.constant 0 : index
    %c0_5 = arith.constant 0 : index
    %17 = vector.load %arg2[%c0_4, %c0_5] : memref<32x16xf32, #tpu.memory_space<vmem>>, vector<32x16xf32>
    tpu.vector_store %arg2[%c0_4, %c0_5], %16 {strides = array<i32>} : memref<32x16xf32, #tpu.memory_space<vmem>>, vector<32x16xf32>,
    return
  }
  func.func @transform_0(%arg0: i32) -> (i32, i32) {
    %c0_i32 = arith.constant 0 : i32
    %c0_i32_0 = arith.constant 0 : i32
    return %arg0, %c0_i32 : i32, i32
  }
  func.func @transform_1(%arg0: i32) -> (i32, i32) {
    %c0_i32 = arith.constant 0 : i32
    %c0_i32_0 = arith.constant 0 : i32
    return %arg0, %c0_i32 : i32, i32
  }
}

</mosaic_0001>

<bundles_post_ra>
// kernel: tpu_custom_call.1
= control target key start
LH: loop header
LB: loop body
LE: loop exit
PB: predicated region body
PF: predicated region fallthrough
CT: control target
= control target key end

     0   :  { %s290_s6 = smov 0   ;;  %s336_s0 = inlined_call_operand.vmem [shape: f32[128,16], index: 0, kind: input, shape index: {}]   ;;  %s337_s1 = inlined_call_operand.vmem [shape: f32[128,16], index: 1, kind: output, shape index: {}]  }
   0x1 LB: > { %s237_s7 = sadd.s32 4294967295, %s278_s6   ;;  %p241_p0 = scmp.ge.s32.totalorder %s278_s6, 1  ;;  %s278_s6 = sphi %s290_s6, %s11_s6  }
   0x2   : > { %p88_p1 = scmp.lt.s32.totalorder %s278_s6, 5 }
   0x4   : > { %p89_p2 = pnand %p241_p0, %p88_p1 }
   0x5   : > { %s242_s8 = sshll.u32 (!%p89_p2), %s237_s7, 2  ;;  %vm176_vm1 = vcmask (!%p89_p2), 130048  }
   0x6   : > { %92 = sbr.rel (%p89_p2) target bundleno = 62 (0x3e), region = 24  ;;  %p109_p3 = scmp.lt.s32.totalorder (!%p89_p2), %s242_s8, 15 }
   0xd   : > { %s339_s8 = smov (!%p109_p3, %s242_s8), 15 }
   0xe   : > { %s243_s9 = sshll.u32 %s339_s8, 3 }
   0xf   : > { %s112_s12 = scalar_lea.vmem %s336_s0, %s243_s9  ;;  %s118_s15 = scalar_lea.vmem %s337_s1, %s243_s9 }
  0x10   : > { %v120_v0 = vld [vmem:[%s112_s12] sm:$0xff]  ;;  %v306_v1 = vld [vmem:[%s112_s12 + $0x8] sm:$0xff]  ;;  %v308_v2 = vld [vmem:[%s112_s12 + $0x10] sm:$0xff] }
  0x11   : > { %v124_v3 = vmul.f32 1.442695, %v120_v0  ;;  %v126_v4 = vmul.f32 1.442695, %v306_v1  ;;  %v128_v5 = vmul.f32 1.442695, %v308_v2 }
  0x12   : > { %v312_v6 = vld [vmem:[%s112_s12 + $0x18] sm:$0xff]  ;;  %vm168_vm0 = vcmp.gt.f32.partialorder %v120_v0, 20.0  ;;  %vm169_vm2 = vcmp.gt.f32.partialorder %v306_v1, 20.0  ;;  %vm170_vm3 = vcmp.gt.f32.partialorder %v308_v2, 20.0 }
  0x13   : > { %256 = vpow2.f32 %v124_v3  ;;  %v130_v7 = vmul.f32 1.442695, %v312_v6  ;;  %vm171_vm4 = vcmp.gt.f32.partialorder %v312_v6, 20.0 }
  0x14   : > { %258 = vpow2.f32 %v126_v4 }
  0x15   : > { %260 = vpow2.f32 %v128_v5 }
  0x16   : > { %262 = vpow2.f32 %v130_v7 }
  0x1d   : > { %v257_v8 = vpop.eup %256 }
  0x1e   : > { %v259_v9 = vpop.eup %258  ;;  %v132_v10 = vadd.f32 2.0, %v257_v8 }
  0x1f   : > { %v261_v11 = vpop.eup %260  ;;  %v133_v12 = vadd.f32 2.0, %v259_v9 }
  0x20   : > { %v263_v13 = vpop.eup %262  ;;  %v136_v14 = vmul.f32 %v257_v8, %v132_v10  ;;  %v134_v15 = vadd.f32 2.0, %v261_v11 }
  0x21   : > { %v137_v16 = vmul.f32 %v259_v9, %v133_v12  ;;  %v135_v17 = vadd.f32 2.0, %v263_v13 }
  0x22   : > { %v140_v18 = vadd.f32 2.0, %v136_v14  ;;  %v138_v19 = vmul.f32 %v261_v11, %v134_v15 }
  0x23   : > { %v141_v20 = vadd.f32 2.0, %v137_v16  ;;  %v139_v21 = vmul.f32 %v263_v13, %v135_v17 }
  0x24   : > { %264 = vrcp.f32 %v140_v18  ;;  %v142_v22 = vadd.f32 2.0, %v138_v19 }
  0x25   : > { %266 = vrcp.f32 %v141_v20  ;;  %v143_v23 = vadd.f32 2.0, %v139_v21 }
  0x26   : > { %268 = vrcp.f32 %v142_v22 }
  0x27   : > { %270 = vrcp.f32 %v143_v23 }
  0x2e   : > { %v265_v24 = vpop.eup %264 }
  0x2f   : > { %v267_v25 = vpop.eup %266  ;;  %v148_v26 = vmul.f32 %v265_v24, %v140_v18 }
  0x30   : > { %v269_v27 = vpop.eup %268  ;;  %v149_v28 = vmul.f32 %v267_v25, %v141_v20 }
  0x31   : > { %v271_v29 = vpop.eup %270  ;;  %v152_v30 = vsub.f32 2.0, %v148_v26  ;;  %v150_v31 = vmul.f32 %v269_v27, %v142_v22 }
  0x32   : > { %v153_v32 = vsub.f32 2.0, %v149_v28  ;;  %v151_v33 = vmul.f32 %v271_v29, %v143_v23 }
  0x33   : > { %v156_v34 = vmul.f32 %v265_v24, %v152_v30  ;;  %v154_v35 = vsub.f32 2.0, %v150_v31 }
  0x34   : > { %v157_v36 = vmul.f32 %v267_v25, %v153_v32  ;;  %v155_v37 = vsub.f32 2.0, %v151_v33 }
  0x35   : > { %v160_v38 = vmul.f32 %v156_v34, %v136_v14  ;;  %v158_v39 = vmul.f32 %v269_v27, %v154_v35 }
  0x36   : > { %v161_v40 = vmul.f32 %v157_v36, %v137_v16  ;;  %v159_v41 = vmul.f32 %v271_v29, %v155_v37 }
  0x37   : > { %v164_v42 = vmul.f32 %v160_v38, %v120_v0  ;;  %v162_v43 = vmul.f32 %v158_v39, %v138_v19 }
  0x38   : > { %v165_v44 = vmul.f32 %v161_v40, %v306_v1  ;;  %v163_v45 = vmul.f32 %v159_v41, %v139_v21 }
  0x39   : > { %v172_v46 = vsel %vm168_vm0, %v120_v0, %v164_v42  ;;  %v166_v47 = vmul.f32 %v162_v43, %v308_v2 }
  0x3a   : > { %177 = vst.msk [vmem:[%s118_s15] sm:$0xff] %vm176_vm1, %v172_v46  ;;  %v173_v48 = vsel %vm169_vm2, %v306_v1, %v165_v44  ;;  %v167_v49 = vmul.f32 %v163_v45, %v312_v6 }
  0x3b   : > { %178 = vst.msk [vmem:[%s118_s15 + $0x8] sm:$0xff] %vm176_vm1, %v173_v48  ;;  %v174_v50 = vsel %vm170_vm3, %v308_v2, %v166_v47 }
  0x3c   : > { %179 = vst.msk [vmem:[%s118_s15 + $0x10] sm:$0xff] %vm176_vm1, %v174_v50  ;;  %v175_v51 = vsel %vm171_vm4, %v312_v6, %v167_v49 }
  0x3d   : > { %180 = vst.msk [vmem:[%s118_s15 + $0x18] sm:$0xff] %vm176_vm1, %v175_v51 }
  0x3e PF: > { %s11_s6 = sadd.s32 1, %s278_s6  }
  0x3f   : > { %p8_p4 = scmp.ge.s32.totalorder %s11_s6, 6  }
  0x41   :  { %10 = sbr.rel (!%p8_p4) target bundleno = 1 (0x1), region = 54 }

</bundles_post_ra>
